<compile_context>
chip_gen: v5e
topology: v5e:2x2
jax: 0.10.0
libtpu: 0.0.40
codegen_flags: <defaults>
</compile_context>

<pallas_src>
import jax
import jax.numpy as jnp
from jax.experimental import pallas as pl
from jax.experimental.pallas import tpu as pltpu


def _round_up(x, m):
    return ((x + m - 1) // m) * m


def _decoder_kernel(tok_ref,                       # (T,) int32 scalar prefetch (SMEM)
                    emb_row_ref,                   # (1, 1, E_pad) bf16 gathered row (relu'd)
                    w_xh_ref,                      # (E_pad + H, 4H) bf16, VMEM-resident
                    b_ref,                         # (1, 4H) f32  (= b_ih + b_hh)
                    w_out_t_ref,                   # (H, O_pad) bf16, VMEM-resident
                    b_out_ref,                     # (1, O_pad) f32 (pad cols = -1e30)
                    h0_ref, c0_ref,                # (1, H) f32 initial state
                    logp_ref,                      # (1, 1, O_pad) f32 output block (per step)
                    h_out_ref, c_out_ref,          # (1, H) f32 final state outputs
                    xh_ref, h_carry, c_carry):     # scratch: (1, E_pad+H) bf16, 2x (1, H) f32
    H = h0_ref.shape[1]
    E_pad = emb_row_ref.shape[2]
    t = pl.program_id(0)

    # Initialize the recurrent state carry on the first step.
    @pl.when(t == 0)
    def _():
        h_carry[...] = h0_ref[...]
        c_carry[...] = c0_ref[...]

    h = h_carry[...]
    c = c_carry[...]

    # Fused gate matmul: [relu(x) ; h] @ [W_ih.T ; 0 ; W_hh.T]  (one MXU pass).
    # The embedding row arrives via the pipeline (scalar-prefetch gather),
    # already relu'd, bf16 and lane-padded; no DMA issue/wait in the hot path.
    xh_ref[:, :E_pad] = emb_row_ref[0]
    xh_ref[:, E_pad:] = h.astype(jnp.bfloat16)
    gates = jnp.dot(xh_ref[...], w_xh_ref[...],
                    preferred_element_type=jnp.float32) + b_ref[...]   # (1, 4H) f32

    # PyTorch LSTM gate order: i, f, g, o.  H = 128 -> lane-aligned slices.
    i_g = jax.nn.sigmoid(gates[:, 0 * H:1 * H])
    f_g = jax.nn.sigmoid(gates[:, 1 * H:2 * H])
    g_g = jnp.tanh(gates[:, 2 * H:3 * H])
    o_g = jax.nn.sigmoid(gates[:, 3 * H:4 * H])
    c_new = f_g * c + i_g * g_g
    h_new = o_g * jnp.tanh(c_new)

    # Output projection (lane-padded to a multiple of 128) + log-softmax (f32).
    logits = jnp.dot(h_new.astype(jnp.bfloat16), w_out_t_ref[...],
                     preferred_element_type=jnp.float32) + b_out_ref[...]  # (1, O_pad)
    m = jnp.max(logits, axis=-1, keepdims=True)
    z = logits - m
    lse = jnp.log(jnp.sum(jnp.exp(z), axis=-1, keepdims=True))
    logp_ref[0] = z - lse

    # Carry state to the next step; emit final state on the last step.
    h_carry[...] = h_new
    c_carry[...] = c_new

    @pl.when(t == pl.num_programs(0) - 1)
    def _():
        h_out_ref[...] = h_new
        c_out_ref[...] = c_new


def prepare_decoder_params(embedding, w_ih, w_hh, b_ih, b_hh, w_out, b_out):
    """PyTorch layouts in: embedding (V,E), w_ih (4H,E), w_hh (4H,H), w_out (O,H).

    Returns kernel-ready params (built once, reused across decode steps):
      * embedding: relu pre-applied, bf16, lane-padded to E_pad, shape (V,1,E_pad)
      * fused gate weight W_xh = [W_ih.T ; 0 ; W_hh.T] (E_pad+H, 4H) bf16
      * folded f32 bias (b_ih + b_hh)
      * output projection lane-padded to a multiple of 128 (pad bias = -1e30)
    """
    V, E = embedding.shape
    H = w_hh.shape[1]
    O = w_out.shape[0]
    E_pad = _round_up(E, 128)
    O_pad = _round_up(O, 128)

    # n_layers == 1: relu(embedding(token)) feeds the LSTM -> pre-apply ReLU.
    emb_relu = jnp.maximum(embedding.astype(jnp.float32), 0.0).astype(jnp.bfloat16)
    emb_p = jnp.zeros((V, 1, E_pad), jnp.bfloat16).at[:, 0, :E].set(emb_relu)

    w_xh = jnp.zeros((E_pad + H, 4 * H), jnp.float32)
    w_xh = w_xh.at[:E, :].set(w_ih.T)            # x contribution
    w_xh = w_xh.at[E_pad:, :].set(w_hh.T)        # h contribution (pad rows stay 0)
    w_xh = w_xh.astype(jnp.bfloat16)

    b = (b_ih + b_hh).reshape(1, -1).astype(jnp.float32)

    w_out_t = jnp.zeros((H, O_pad), jnp.float32).at[:, :O].set(w_out.T)
    w_out_t = w_out_t.astype(jnp.bfloat16)
    b_out_p = jnp.full((1, O_pad), -1e30, dtype=jnp.float32).at[0, :O].set(b_out)

    params = (emb_p, w_xh, b, w_out_t, b_out_p)
    return params, O


def decoder_rnn_decode(tokens, hidden, kernel_params, out_size):
    """Teacher-forced T-step decode. tokens: (T,) int32; hidden: (h, c) each (1,1,H).

    Returns (logp (T, O), (h, c)) — step t equals forward(tokens[t], hidden_t).
    """
    emb_p, w_xh, b, w_out_t, b_out_p = kernel_params
    V, _, E_pad = emb_p.shape
    H = hidden[0].shape[-1]
    O_pad = w_out_t.shape[1]
    T = tokens.shape[0]

    h0 = hidden[0].reshape(1, H).astype(jnp.float32)
    c0 = hidden[1].reshape(1, H).astype(jnp.float32)
    # Index-map gathers have no runtime bounds check -> clamp tokens.
    tokens = jnp.clip(tokens.astype(jnp.int32), 0, V - 1)

    def const_spec(shape):
        zeros = (0,) * len(shape)
        return pl.BlockSpec(shape, lambda t, tok: zeros)

    grid_spec = pltpu.PrefetchScalarGridSpec(
        num_scalar_prefetch=1,
        grid=(T,),
        in_specs=[
            # Embedding row gather driven by the scalar-prefetched token ids.
            pl.BlockSpec((1, 1, E_pad), lambda t, tok: (tok[t], 0, 0)),
            const_spec(w_xh.shape),
            const_spec(b.shape),
            const_spec(w_out_t.shape),
            const_spec(b_out_p.shape),
            const_spec((1, H)),
            const_spec((1, H)),
        ],
        out_specs=[
            pl.BlockSpec((1, 1, O_pad), lambda t, tok: (t, 0, 0)),   # per-step logp
            const_spec((1, H)),                                       # final h
            const_spec((1, H)),                                       # final c
        ],
        scratch_shapes=[
            pltpu.VMEM((1, E_pad + H), jnp.bfloat16),   # fused [x ; h] matmul operand
            pltpu.VMEM((1, H), jnp.float32),            # h carry across steps
            pltpu.VMEM((1, H), jnp.float32),            # c carry across steps
        ],
    )

    # Explicit VMEM budget (pipeline may double-buffer inputs) + headroom.
    resident = sum(int(a.size) * a.dtype.itemsize
                   for a in (w_xh, b, w_out_t, b_out_p, h0, c0))
    resident += E_pad * 2 + O_pad * 4 + 2 * H * 4          # emb-row / logp / h,c blocks
    resident += (E_pad + H) * 2 + 2 * H * 4                # scratch
    vmem_limit = int(max(16 * 1024 * 1024, 2 * resident + (2 << 20)))

    logp_pad, h_new, c_new = pl.pallas_call(
        _decoder_kernel,
        grid_spec=grid_spec,
        out_shape=(
            jax.ShapeDtypeStruct((T, 1, O_pad), jnp.float32),
            jax.ShapeDtypeStruct((1, H), jnp.float32),
            jax.ShapeDtypeStruct((1, H), jnp.float32),
        ),
        compiler_params=pltpu.CompilerParams(
            dimension_semantics=("arbitrary",),        # sequential recurrence over t
            vmem_limit_bytes=vmem_limit),
    )(tokens, emb_p, w_xh, b, w_out_t, b_out_p, h0, c0)

    logp = logp_pad[:, 0, :out_size]
    return logp, (h_new.reshape(1, 1, H), c_new.reshape(1, 1, H))


def decoder_rnn_forward(token, hidden, kernel_params, out_size):
    """Single-step forward(input, hidden), matching the PyTorch module.

    token: int32 (1,);  hidden: (h, c) each (1,1,H).  Returns (logp (1,O), (h,c)).
    """
    return decoder_rnn_decode(token.reshape(1), hidden, kernel_params, out_size)


def _reference_decode(tokens, hidden, kernel_params, out_size):
    """Pure-JAX reference mirroring the kernel's math (bf16 matmul operands, f32 accum)."""
    emb_p, w_xh, b, w_out_t, b_out_p = kernel_params
    H = hidden[0].shape[-1]
    f32 = jnp.float32
    bf = lambda a: a.astype(jnp.bfloat16).astype(f32)

    h = hidden[0].reshape(1, H).astype(f32)
    c = hidden[1].reshape(1, H).astype(f32)
    logps = []
    for t in range(tokens.shape[0]):
        x = emb_p[tokens[t], 0][None, :].astype(f32)            # relu'd, bf16, padded
        xh = jnp.concatenate([x, bf(h)], axis=1)                 # (1, E_pad + H)
        gates = xh @ w_xh.astype(f32) + b
        i_g = jax.nn.sigmoid(gates[:, 0 * H:1 * H])
        f_g = jax.nn.sigmoid(gates[:, 1 * H:2 * H])
        g_g = jnp.tanh(gates[:, 2 * H:3 * H])
        o_g = jax.nn.sigmoid(gates[:, 3 * H:4 * H])
        c = f_g * c + i_g * g_g
        h = o_g * jnp.tanh(c)
        logits = bf(h) @ w_out_t.astype(f32) + b_out_p
        logps.append(jax.nn.log_softmax(logits, axis=-1)[:, :out_size])
    return jnp.concatenate(logps, axis=0), (h.reshape(1, 1, H), c.reshape(1, 1, H))


if __name__ == "__main__":
    # Small shapes consistent with the module; H = 128 for lane-aligned gate slices.
    VOCAB, EMB, HID, OUT, T = 100, 64, 128, 20, 6

    key = jax.random.PRNGKey(0)
    ks = jax.random.split(key, 10)
    scale = 0.1
    embedding = scale * jax.random.normal(ks[0], (VOCAB, EMB), jnp.float32)
    w_ih = scale * jax.random.normal(ks[1], (4 * HID, EMB), jnp.float32)   # PyTorch layout
    w_hh = scale * jax.random.normal(ks[2], (4 * HID, HID), jnp.float32)
    b_ih = scale * jax.random.normal(ks[3], (4 * HID,), jnp.float32)
    b_hh = scale * jax.random.normal(ks[4], (4 * HID,), jnp.float32)
    w_out = scale * jax.random.normal(ks[5], (OUT, HID), jnp.float32)
    b_out = scale * jax.random.normal(ks[6], (OUT,), jnp.float32)
    # Non-zero initial state (review: zeros would mask state-handling bugs).
    h0 = scale * jax.random.normal(ks[7], (1, 1, HID), jnp.float32)
    c0 = scale * jax.random.normal(ks[8], (1, 1, HID), jnp.float32)
    hidden = (h0, c0)

    tokens = jax.random.randint(ks[9], (T,), 0, VOCAB, dtype=jnp.int32)

    kparams, out_size = prepare_decoder_params(
        embedding, w_ih, w_hh, b_ih, b_hh, w_out, b_out)

    # Multi-step (T-step, teacher-forced) decode: weights stay VMEM-resident.
    logp_ref, (h_ref, c_ref) = _reference_decode(tokens, hidden, kparams, out_size)
    logp, (h_new, c_new) = decoder_rnn_decode(tokens, hidden, kparams, out_size)
    jax.block_until_ready((logp, h_new, c_new))

    assert logp.shape == (T, OUT) and h_new.shape == (1, 1, HID) and c_new.shape == (1, 1, HID)
    assert jnp.allclose(logp, logp_ref, atol=1e-3), "multi-step log-softmax mismatch"
    assert jnp.allclose(h_new, h_ref, atol=1e-3), "multi-step hidden state mismatch"
    assert jnp.allclose(c_new, c_ref, atol=1e-3), "multi-step cell state mismatch"

    # Single-step forward(input, hidden) — the module's signature — is T = 1.
    logp1_ref, (h1_ref, c1_ref) = _reference_decode(tokens[:1], hidden, kparams, out_size)
    logp1, (h1, c1) = decoder_rnn_forward(tokens[:1], hidden, kparams, out_size)
    jax.block_until_ready((logp1, h1, c1))

    assert logp1.shape == (1, OUT)
    assert jnp.allclose(logp1, logp1_ref, atol=1e-3), "single-step log-softmax mismatch"
    assert jnp.allclose(h1, h1_ref, atol=1e-3), "single-step hidden state mismatch"
    assert jnp.allclose(c1, c1_ref, atol=1e-3), "single-step cell state mismatch"

    print("KERNEL_OK")
</pallas_src>

<mosaic_0001>
module attributes {stable_mosaic.version = 11 : i64} {
  func.func @_decoder_kernel(%arg0: i32, %arg1: memref<6xi32, #tpu.memory_space<smem>>, %arg2: memref<1x1x128xbf16, #tpu.memory_space<vmem>>, %arg3: memref<256x512xbf16, #tpu.memory_space<vmem>>, %arg4: memref<1x512xf32, #tpu.memory_space<vmem>>, %arg5: memref<128x128xbf16, #tpu.memory_space<vmem>>, %arg6: memref<1x128xf32, #tpu.memory_space<vmem>>, %arg7: memref<1x128xf32, #tpu.memory_space<vmem>>, %arg8: memref<1x128xf32, #tpu.memory_space<vmem>>, %arg9: memref<1x1x128xf32, #tpu.memory_space<vmem>>, %arg10: memref<1x128xf32, #tpu.memory_space<vmem>>, %arg11: memref<1x128xf32, #tpu.memory_space<vmem>>, %arg12: memref<1x256xbf16, #tpu.memory_space<vmem>>, %arg13: memref<1x128xf32, #tpu.memory_space<vmem>>, %arg14: memref<1x128xf32, #tpu.memory_space<vmem>>) attributes {dimension_semantics = [#tpu.dimension_semantics<arbitrary>], iteration_bounds = array<i64: 6>, scalar_prefetch = 1 : i64, scratch_operands = 3 : i64, tpu.core_type = #tpu.core_type<tc>, window_params = [{transform_indices = @transform_0, window_bounds = array<i64: 1, 1, 128>}, {pipeline_mode = #tpu.pipeline_mode<synchronous>, transform_indices = @transform_1, window_bounds = array<i64: 256, 512>}, {pipeline_mode = #tpu.pipeline_mode<synchronous>, transform_indices = @transform_2, window_bounds = array<i64: 1, 512>}, {pipeline_mode = #tpu.pipeline_mode<synchronous>, transform_indices = @transform_3, window_bounds = array<i64: 128, 128>}, {pipeline_mode = #tpu.pipeline_mode<synchronous>, transform_indices = @transform_4, window_bounds = array<i64: 1, 128>}, {pipeline_mode = #tpu.pipeline_mode<synchronous>, transform_indices = @transform_5, window_bounds = array<i64: 1, 128>}, {pipeline_mode = #tpu.pipeline_mode<synchronous>, transform_indices = @transform_6, window_bounds = array<i64: 1, 128>}, {transform_indices = @transform_7, window_bounds = array<i64: 1, 1, 128>}, {pipeline_mode = #tpu.pipeline_mode<synchronous>, transform_indices = @transform_8, window_bounds = array<i64: 1, 128>}, {pipeline_mode = #tpu.pipeline_mode<synchronous>, transform_indices = @transform_9, window_bounds = array<i64: 1, 128>}]} {
    %c0_i32 = arith.constant 0 : i32
    %0 = arith.cmpi eq, %arg0, %c0_i32 : i32
    %1 = arith.extui %0 : i1 to i32
    %c0_i32_0 = arith.constant 0 : i32
    %2 = arith.cmpi ne, %1, %c0_i32_0 : i32
    scf.if %2 {
      %c0_34 = arith.constant 0 : index
      %c0_35 = arith.constant 0 : index
      %63 = vector.load %arg7[%c0_34, %c0_35] : memref<1x128xf32, #tpu.memory_space<vmem>>, vector<1x128xf32>
      %c0_36 = arith.constant 0 : index
      %c0_37 = arith.constant 0 : index
      %64 = vector.load %arg13[%c0_36, %c0_37] : memref<1x128xf32, #tpu.memory_space<vmem>>, vector<1x128xf32>
      tpu.vector_store %arg13[%c0_36, %c0_37], %63 {strides = array<i32>} : memref<1x128xf32, #tpu.memory_space<vmem>>, vector<1x128xf32>,
      %c0_38 = arith.constant 0 : index
      %c0_39 = arith.constant 0 : index
      %65 = vector.load %arg8[%c0_38, %c0_39] : memref<1x128xf32, #tpu.memory_space<vmem>>, vector<1x128xf32>
      %c0_40 = arith.constant 0 : index
      %c0_41 = arith.constant 0 : index
      %66 = vector.load %arg14[%c0_40, %c0_41] : memref<1x128xf32, #tpu.memory_space<vmem>>, vector<1x128xf32>
      tpu.vector_store %arg14[%c0_40, %c0_41], %65 {strides = array<i32>} : memref<1x128xf32, #tpu.memory_space<vmem>>, vector<1x128xf32>,
    } else {
    }
    %c0 = arith.constant 0 : index
    %c0_1 = arith.constant 0 : index
    %3 = vector.load %arg13[%c0, %c0_1] : memref<1x128xf32, #tpu.memory_space<vmem>>, vector<1x128xf32>
    %c0_2 = arith.constant 0 : index
    %c0_3 = arith.constant 0 : index
    %4 = vector.load %arg14[%c0_2, %c0_3] : memref<1x128xf32, #tpu.memory_space<vmem>>, vector<1x128xf32>
    %c0_4 = arith.constant 0 : index
    %c0_5 = arith.constant 0 : index
    %c0_6 = arith.constant 0 : index
    %5 = vector.load %arg2[%c0_4, %c0_5, %c0_6] : memref<1x1x128xbf16, #tpu.memory_space<vmem>>, vector<1x1x128xbf16>
    %6 = vector.shape_cast %5 : vector<1x1x128xbf16> to vector<1x128xbf16>
    %c0_7 = arith.constant 0 : index
    %c0_8 = arith.constant 0 : index
    %7 = vector.load %arg12[%c0_7, %c0_8] : memref<1x256xbf16, #tpu.memory_space<vmem>>, vector<1x128xbf16>
    tpu.vector_store %arg12[%c0_7, %c0_8], %6 {strides = array<i32>} : memref<1x256xbf16, #tpu.memory_space<vmem>>, vector<1x128xbf16>,
    %8 = arith.truncf %3 : vector<1x128xf32> to vector<1x128xbf16>
    %c0_9 = arith.constant 0 : index
    %c128 = arith.constant 128 : index
    %9 = vector.load %arg12[%c0_9, %c128] : memref<1x256xbf16, #tpu.memory_space<vmem>>, vector<1x128xbf16>
    tpu.vector_store %arg12[%c0_9, %c128], %8 {strides = array<i32>} : memref<1x256xbf16, #tpu.memory_space<vmem>>, vector<1x128xbf16>,
    %c0_10 = arith.constant 0 : index
    %c0_11 = arith.constant 0 : index
    %10 = vector.load %arg12[%c0_10, %c0_11] : memref<1x256xbf16, #tpu.memory_space<vmem>>, vector<1x256xbf16>
    %c0_12 = arith.constant 0 : index
    %c0_13 = arith.constant 0 : index
    %11 = vector.load %arg3[%c0_12, %c0_13] : memref<256x512xbf16, #tpu.memory_space<vmem>>, vector<256x512xbf16>
    %cst = arith.constant dense<0.000000e+00> : vector<1x512xf32>
    %12 = tpu.matmul %10, %11, %cst {dimension_numbers = #tpu.dot_dimension_numbers<[1], [0], [0], [1], [0, 0, 1, 1], [], []>} : vector<1x256xbf16>, vector<256x512xbf16>, vector<1x512xf32> -> vector<1x512xf32>
    %c0_14 = arith.constant 0 : index
    %c0_15 = arith.constant 0 : index
    %13 = vector.load %arg4[%c0_14, %c0_15] : memref<1x512xf32, #tpu.memory_space<vmem>>, vector<1x512xf32>
    %14 = arith.addf %12, %13 : vector<1x512xf32>
    %15 = vector.extract_strided_slice %14 {offsets = [0, 0], sizes = [1, 128], strides = [1, 1]} : vector<1x512xf32> to vector<1x128xf32>
    %16 = arith.negf %15 : vector<1x128xf32>
    %17 = math.exp %16 : vector<1x128xf32>
    %cst_16 = arith.constant 1.000000e+00 : f32
    %18 = vector.broadcast %cst_16 : f32 to vector<1x128xf32>
    %19 = arith.addf %18, %17 : vector<1x128xf32>
    %20 = arith.divf %18, %19 : vector<1x128xf32>
    %21 = vector.extract_strided_slice %14 {offsets = [0, 128], sizes = [1, 128], strides = [1, 1]} : vector<1x512xf32> to vector<1x128xf32>
    %22 = arith.negf %21 : vector<1x128xf32>
    %23 = math.exp %22 : vector<1x128xf32>
    %cst_17 = arith.constant 1.000000e+00 : f32
    %24 = vector.broadcast %cst_17 : f32 to vector<1x128xf32>
    %25 = arith.addf %24, %23 : vector<1x128xf32>
    %26 = arith.divf %24, %25 : vector<1x128xf32>
    %27 = vector.extract_strided_slice %14 {offsets = [0, 256], sizes = [1, 128], strides = [1, 1]} : vector<1x512xf32> to vector<1x128xf32>
    %28 = math.tanh %27 : vector<1x128xf32>
    %29 = vector.extract_strided_slice %14 {offsets = [0, 384], sizes = [1, 128], strides = [1, 1]} : vector<1x512xf32> to vector<1x128xf32>
    %30 = arith.negf %29 : vector<1x128xf32>
    %31 = math.exp %30 : vector<1x128xf32>
    %cst_18 = arith.constant 1.000000e+00 : f32
    %32 = vector.broadcast %cst_18 : f32 to vector<1x128xf32>
    %33 = arith.addf %32, %31 : vector<1x128xf32>
    %34 = arith.divf %32, %33 : vector<1x128xf32>
    %35 = arith.mulf %26, %4 : vector<1x128xf32>
    %36 = arith.mulf %20, %28 : vector<1x128xf32>
    %37 = arith.addf %35, %36 : vector<1x128xf32>
    %38 = math.tanh %37 : vector<1x128xf32>
    %39 = arith.mulf %34, %38 : vector<1x128xf32>
    %40 = arith.truncf %39 : vector<1x128xf32> to vector<1x128xbf16>
    %c0_19 = arith.constant 0 : index
    %c0_20 = arith.constant 0 : index
    %41 = vector.load %arg5[%c0_19, %c0_20] : memref<128x128xbf16, #tpu.memory_space<vmem>>, vector<128x128xbf16>
    %cst_21 = arith.constant dense<0.000000e+00> : vector<1x128xf32>
    %42 = tpu.matmul %40, %41, %cst_21 {dimension_numbers = #tpu.dot_dimension_numbers<[1], [0], [0], [1], [0, 0, 1, 1], [], []>} : vector<1x128xbf16>, vector<128x128xbf16>, vector<1x128xf32> -> vector<1x128xf32>
    %c0_22 = arith.constant 0 : index
    %c0_23 = arith.constant 0 : index
    %43 = vector.load %arg6[%c0_22, %c0_23] : memref<1x128xf32, #tpu.memory_space<vmem>>, vector<1x128xf32>
    %44 = arith.addf %42, %43 : vector<1x128xf32>
    %cst_24 = arith.constant dense<0xFF800000> : vector<1xf32>
    %45 = vector.multi_reduction <maximumf>, %44, %cst_24 [1] : vector<1x128xf32> to vector<1xf32>
    %46 = vector.shape_cast %45 : vector<1xf32> to vector<1x1xf32>
    %47 = vector.broadcast %46 : vector<1x1xf32> to vector<1x128xf32>
    %48 = arith.subf %44, %47 : vector<1x128xf32>
    %49 = math.exp %48 : vector<1x128xf32>
    %cst_25 = arith.constant dense<0.000000e+00> : vector<1xf32>
    %50 = vector.multi_reduction <add>, %49, %cst_25 [1] : vector<1x128xf32> to vector<1xf32>
    %51 = vector.shape_cast %50 : vector<1xf32> to vector<1x1xf32>
    %52 = math.log %51 : vector<1x1xf32>
    %53 = vector.broadcast %52 : vector<1x1xf32> to vector<1x128xf32>
    %54 = arith.subf %48, %53 : vector<1x128xf32>
    %c0_26 = arith.constant 0 : index
    %c0_27 = arith.constant 0 : index
    %c0_28 = arith.constant 0 : index
    %55 = vector.load %arg9[%c0_26, %c0_27, %c0_28] : memref<1x1x128xf32, #tpu.memory_space<vmem>>, vector<1x1x128xf32>
    %56 = vector.shape_cast %55 : vector<1x1x128xf32> to vector<1x128xf32>
    %57 = vector.shape_cast %54 : vector<1x128xf32> to vector<1x1x128xf32>
    tpu.vector_store %arg9[%c0_26, %c0_27, %c0_28], %57 {strides = array<i32>} : memref<1x1x128xf32, #tpu.memory_space<vmem>>, vector<1x1x128xf32>,
    %c0_29 = arith.constant 0 : index
    %c0_30 = arith.constant 0 : index
    %58 = vector.load %arg13[%c0_29, %c0_30] : memref<1x128xf32, #tpu.memory_space<vmem>>, vector<1x128xf32>
    tpu.vector_store %arg13[%c0_29, %c0_30], %39 {strides = array<i32>} : memref<1x128xf32, #tpu.memory_space<vmem>>, vector<1x128xf32>,
    %c0_31 = arith.constant 0 : index
    %c0_32 = arith.constant 0 : index
    %59 = vector.load %arg14[%c0_31, %c0_32] : memref<1x128xf32, #tpu.memory_space<vmem>>, vector<1x128xf32>
    tpu.vector_store %arg14[%c0_31, %c0_32], %37 {strides = array<i32>} : memref<1x128xf32, #tpu.memory_space<vmem>>, vector<1x128xf32>,
    %c5_i32 = arith.constant 5 : i32
    %60 = arith.cmpi eq, %arg0, %c5_i32 : i32
    %61 = arith.extui %60 : i1 to i32
    %c0_i32_33 = arith.constant 0 : i32
    %62 = arith.cmpi ne, %61, %c0_i32_33 : i32
    scf.if %62 {
      %c0_34 = arith.constant 0 : index
      %c0_35 = arith.constant 0 : index
      %63 = vector.load %arg10[%c0_34, %c0_35] : memref<1x128xf32, #tpu.memory_space<vmem>>, vector<1x128xf32>
      tpu.vector_store %arg10[%c0_34, %c0_35], %39 {strides = array<i32>} : memref<1x128xf32, #tpu.memory_space<vmem>>, vector<1x128xf32>,
      %c0_36 = arith.constant 0 : index
      %c0_37 = arith.constant 0 : index
      %64 = vector.load %arg11[%c0_36, %c0_37] : memref<1x128xf32, #tpu.memory_space<vmem>>, vector<1x128xf32>
      tpu.vector_store %arg11[%c0_36, %c0_37], %37 {strides = array<i32>} : memref<1x128xf32, #tpu.memory_space<vmem>>, vector<1x128xf32>,
    } else {
    }
    return
  }
  func.func @transform_0(%arg0: i32, %arg1: memref<6xi32, #tpu.memory_space<smem>>) -> (i32, i32, i32) {
    %0 = arith.index_cast %arg0 : i32 to index
    %1 = memref.load %arg1[%0] : memref<6xi32, #tpu.memory_space<smem>>
    %c0_i32 = arith.constant 0 : i32
    %c0_i32_0 = arith.constant 0 : i32
    %c0_i32_1 = arith.constant 0 : i32
    return %1, %c0_i32, %c0_i32_0 : i32, i32, i32
  }
  func.func @transform_1(%arg0: i32, %arg1: memref<6xi32, #tpu.memory_space<smem>>) -> (i32, i32) {
    %c0_i32 = arith.constant 0 : i32
    %c0_i32_0 = arith.constant 0 : i32
    %c0_i32_1 = arith.constant 0 : i32
    return %c0_i32, %c0_i32_0 : i32, i32
  }
  func.func @transform_2(%arg0: i32, %arg1: memref<6xi32, #tpu.memory_space<smem>>) -> (i32, i32) {
    %c0_i32 = arith.constant 0 : i32
    %c0_i32_0 = arith.constant 0 : i32
    %c0_i32_1 = arith.constant 0 : i32
    return %c0_i32, %c0_i32_0 : i32, i32
  }
  func.func @transform_3(%arg0: i32, %arg1: memref<6xi32, #tpu.memory_space<smem>>) -> (i32, i32) {
    %c0_i32 = arith.constant 0 : i32
    %c0_i32_0 = arith.constant 0 : i32
    %c0_i32_1 = arith.constant 0 : i32
    return %c0_i32, %c0_i32_0 : i32, i32
  }
  func.func @transform_4(%arg0: i32, %arg1: memref<6xi32, #tpu.memory_space<smem>>) -> (i32, i32) {
    %c0_i32 = arith.constant 0 : i32
    %c0_i32_0 = arith.constant 0 : i32
    %c0_i32_1 = arith.constant 0 : i32
    return %c0_i32, %c0_i32_0 : i32, i32
  }
  func.func @transform_5(%arg0: i32, %arg1: memref<6xi32, #tpu.memory_space<smem>>) -> (i32, i32) {
    %c0_i32 = arith.constant 0 : i32
    %c0_i32_0 = arith.constant 0 : i32
    %c0_i32_1 = arith.constant 0 : i32
    return %c0_i32, %c0_i32_0 : i32, i32
  }
  func.func @transform_6(%arg0: i32, %arg1: memref<6xi32, #tpu.memory_space<smem>>) -> (i32, i32) {
    %c0_i32 = arith.constant 0 : i32
    %c0_i32_0 = arith.constant 0 : i32
    %c0_i32_1 = arith.constant 0 : i32
    return %c0_i32, %c0_i32_0 : i32, i32
  }
  func.func @transform_7(%arg0: i32, %arg1: memref<6xi32, #tpu.memory_space<smem>>) -> (i32, i32, i32) {
    %c0_i32 = arith.constant 0 : i32
    %c0_i32_0 = arith.constant 0 : i32
    %c0_i32_1 = arith.constant 0 : i32
    return %arg0, %c0_i32, %c0_i32_0 : i32, i32, i32
  }
  func.func @transform_8(%arg0: i32, %arg1: memref<6xi32, #tpu.memory_space<smem>>) -> (i32, i32) {
    %c0_i32 = arith.constant 0 : i32
    %c0_i32_0 = arith.constant 0 : i32
    %c0_i32_1 = arith.constant 0 : i32
    return %c0_i32, %c0_i32_0 : i32, i32
  }
  func.func @transform_9(%arg0: i32, %arg1: memref<6xi32, #tpu.memory_space<smem>>) -> (i32, i32) {
    %c0_i32 = arith.constant 0 : i32
    %c0_i32_0 = arith.constant 0 : i32
    %c0_i32_1 = arith.constant 0 : i32
    return %c0_i32, %c0_i32_0 : i32, i32
  }
}

</mosaic_0001>

<bundles_post_ra>
// kernel: tpu_custom_call.1
= control target key start
LH: loop header
LB: loop body
LE: loop exit
PB: predicated region body
PF: predicated region fallthrough
CT: control target
= control target key end

     0   :  { %s1803_s16 = smov [#allocation6]   ;;  %s2060_s0 = inlined_call_operand.vmem [shape: s32[6], index: 0, kind: input, shape index: {}]   ;;  %s2061_s1 = inlined_call_operand.vmem [shape: bf16[100,1,128], index: 1, kind: input, shape index: {}]   ;;  %s2062_s2 = inlined_call_operand.hbm [shape: bf16[256,512], index: 2, kind: input, shape index: {}]   ;;  %s2063_s3 = inlined_call_operand.vmem [shape: f32[1,512], index: 3, kind: input, shape index: {}]   ;;  %s2064_s4 = inlined_call_operand.vmem [shape: bf16[128,128], index: 4, kind: input, shape index: {}]   ;;  %s2065_s5 = inlined_call_operand.vmem [shape: f32[1,128], index: 5, kind: input, shape index: {}]   ;;  %s2066_s6 = inlined_call_operand.vmem [shape: f32[1,128], index: 6, kind: input, shape index: {}]   ;;  %s2067_s7 = inlined_call_operand.vmem [shape: f32[1,128], index: 7, kind: input, shape index: {}]   ;;  %s2068_s8 = inlined_call_operand.hbm [shape: f32[6,1,128], index: 8, kind: output, shape index: {0}]   ;;  %s2069_s9 = inlined_call_operand.hbm [shape: f32[1,128], index: 9, kind: output, shape index: {1}]   ;;  %s2070_s10 = inlined_call_operand.hbm [shape: f32[1,128], index: 10, kind: output, shape index: {2}]  }
   0x1   :  { %2071 = sst [smem:[#allocation18_spill]] %s2061_s1  ;;  %s17_s15 = sshll.u32 %s2060_s0, 4  ;;  %s18_s15 = int_to_ptr.vmem [resolvable:$true] %s17_s15 }
   0x2   :  { %2072 = sst [smem:[#allocation19_spill]] %s2062_s2 }
   0x3   :  { %20 = dma.vmem_to_smem %s18_s15, 16, %s1803_s16, [#allocation5] }
   0x4   :  { %1773 = dma.done.wait [#allocation5], 16 }
   0x5   :  { %1774 = vsyncadd [#allocation5], 4294967280 }
   0x6   :  { %23 = sfence }
   0x7   :  { %24 = vsyncpa [#allocation8], 0 }
   0x8   :  { %25 = vsyncpa [#allocation9], 0 }
   0x9   :  { %27 = vsyncpa [#allocation9 + $0x1], 0 }
   0xa   :  { %28 = vsyncpa [#allocation12], 0  ;;  %s1867_s17 = smov 0   ;;  %s1869_s18 = smov 0  }
   0xb   :  { %s1871_s19 = smov 0   ;;  %s1873_s20 = smov 0  }
   0xc LB: > { %s1888_s0 = sadd.s32 4294967295, %s1801_s20   ;;  %s1167_s21 = sadd.s32 4294967294, %s1801_s20   ;;  %s1801_s20 = sphi %s1873_s20, %s2085_s20   ;;  %s1797_s19 = sphi %s1871_s19, %s2084_s19   ;;  %s1793_s18 = sphi %s1869_s18, %s2083_s18   ;;  %s1789_s17 = sphi %s1867_s17, %s2082_s17  }
   0xd   : > { %s1892_s22 = sadd.s32 1, %s1801_s20   ;;  %s195_s23 = sadd.s32 1, %s1797_s19 }
   0xe   : > { %s192_s24 = ssub.s32 %s1801_s20, %s1892_s22  ;;  %p205_p0 = scmp.ne.s32.totalorder %s1797_s19, %s1793_s18 }
   0xf   : > { %p193_p1 = scmp.eq.s32.totalorder %s192_s24, 0  ;;  %p206_p2 = scmp.eq.s32.totalorder %s1888_s0, 5 }
  0x10   : > { %p211_p3 = scmp.ne.s32.totalorder %s1793_s18, %s1789_s17  ;;  %p212_p4 = scmp.eq.s32.totalorder %s1167_s21, 5 }
  0x11   : > { %s1903_s25 = scalar_select %p193_p1, %s1797_s19, %s195_s23  }
  0x12   : > { %p1907_p5 = por %p206_p2, %p205_p0  ;;  %p1911_p6 = por %p212_p4, %p211_p3 }
  0x13   : > { %p1168_p7 = scmp.ge.s32.totalorder %s1801_s20, 1  ;;  %p261_p8 = scmp.lt.s32.totalorder %s1801_s20, 7 }
  0x14   : > { %p1169_p9 = scmp.ne.s32.totalorder %s1888_s0, 0  ;;  %p1566_p10 = scmp.eq.s32.totalorder %s1888_s0, 0 }
  0x15   : > { %p262_p11 = pnand %p1168_p7, %p261_p8  ;;  %s2075_s2 = sld [smem:[#allocation19_spill]] }
  0x16   : > { %s1804_s11 = smov [#allocation7]   ;;  %s1805_s13 = smov 256  }
  0x17   : > { %p1558_p12 = pneg %p262_p11  ;;  %s274_s12 = sshll.u32 %s1804_s11, 4  ;;  %s275_s12 = int_to_ptr.vmem [resolvable:$true] %s274_s12 }
  0x18   : > { %s1806_s14 = smov 16   ;;  %313 = sbr.rel (%p262_p11) target bundleno = 686 (0x2ae), region = 48 }
  0x19   : > { %p1559_p13 = pnand %p1566_p10, %p1558_p12 }
  0x1b   : > { %s272_s30 = sshll.u32 %s2075_s2, 4  ;;  %s273_s30 = int_to_ptr.hbm [resolvable:$true] %s272_s30 }
  0x1c   : > { %1561 = dma.hbm_to_vmem [thread:$0]  (!%p1559_p13), %s273_s30, 8192, %s275_s12, [#allocation8], %s1805_s13, %s1805_s13, %s1806_s14  }
  0x1d   : > { %1776 = dma.done.wait (%p1566_p10), [#allocation8], 8192  }
  0x1e   : > { %1778 = vsyncadd (%p1566_p10), [#allocation8], 4294959104  ;;  %s342_s15 = sand.u32 1, %s1793_s18   ;;  %s348_s16 = sld [smem:[#allocation6 + %s1888_s0]] }
  0x1f   : > { %s2076_s1 = sld [smem:[#allocation18_spill]]  ;;  %s1938_s28 = scalar_lea.vmem [#allocation10], %s342_s15 }
  0x23   : > { %356 = sbr.rel (%p1169_p9) target bundleno = 43 (0x2b), region = 56 }
  0x24   : > { %p349_p0 = scmp.lt.s32.totalorder %s348_s16, 99 }
  0x26   : > { %s2087_s16 = smov (!%p349_p0, %s348_s16), 99 }
  0x27   : > { %s351_s24 = scalar_lea.vmem %s2076_s1, %s2087_s16 }
  0x28   : > { %v357_v0 = vld [vmem:[%s2066_s6] sm:$0x1] }
  0x29   : > { %v359_v1 = vld [vmem:[%s2067_s7] sm:$0x1]  ;;  %358 = vst [vmem:[#allocation3] sm:$0x1] %v357_v0 }
  0x2a   : > { %360 = vst [vmem:[#allocation4] sm:$0x1] %v359_v1 }
  0x2b PF: > { %v1288_v2 = vld [vmem:[#allocation7 + $0xe0] sm:$0xf]  ;;  %v1502_v3 = vld [vmem:[#allocation7 + $0xec] sm:$0xf0]  ;;  %v1500_v4 = vld [vmem:[#allocation7 + $0xe4] sm:$0xf] }
  0x2c   : > { %v1289_v5 = vor.u32 %v1502_v3, %v1288_v2  ;;  %v1290_v6 = vld [vmem:[#allocation7 + $0xf0] sm:$0xf0]  ;;  %v1532_v7 = vld [vmem:[#allocation7 + $0x1e4] sm:$0xf]  ;;  %v1416_v11 = vld [vmem:[#allocation7 + $0x1e0] sm:$0xf] }
  0x2d   : > { %v1418_v8 = vld [vmem:[#allocation7 + $0x1f0] sm:$0xf0]  ;;  %v1293_v9 = vor.u32 %v1500_v4, %v1290_v6  ;;  %v1534_v12 = vld [vmem:[#allocation7 + $0x1ec] sm:$0xf0]  ;;  %v1272_v13 = vld [vmem:[#allocation7 + $0xc0] sm:$0xf] }
  0x2e   : > { %v1421_v10 = vor.u32 %v1532_v7, %v1418_v8  ;;  %775 = vmatpush.bf16.msra.mxu0 %v1289_v5  ;;  %v1417_v14 = vor.u32 %v1534_v12, %v1416_v11  ;;  %v1498_v15 = vld [vmem:[#allocation7 + $0xcc] sm:$0xf0]  ;;  %v1496_v16 = vld [vmem:[#allocation7 + $0xc4] sm:$0xf]  ;;  %v1274_v17 = vld [vmem:[#allocation7 + $0xd0] sm:$0xf0] }
  0x2f   : > { %801 = vmatpush.bf16.msra.mxu2 %v1293_v9  ;;  %v1273_v18 = vor.u32 %v1498_v15, %v1272_v13  ;;  %v1277_v19 = vor.u32 %v1496_v16, %v1274_v17  ;;  %v1528_v20 = vld [vmem:[#allocation7 + $0x1c4] sm:$0xf]  ;;  %v1402_v21 = vld [vmem:[#allocation7 + $0x1d0] sm:$0xf0]  ;;  %v1400_v22 = vld [vmem:[#allocation7 + $0x1c0] sm:$0xf] }
  0x30   : > { %814 = vmatpush.bf16.msra.mxu3 %v1421_v10  ;;  %788 = vmatpush.bf16.msra.mxu1 %v1417_v14  ;;  %v1405_v23 = vor.u32 %v1528_v20, %v1402_v21  ;;  %v1530_v24 = vld [vmem:[#allocation7 + $0x1cc] sm:$0xf0]  ;;  %v1256_v25 = vld [vmem:[#allocation7 + $0xa0] sm:$0xf]  ;;  %v1492_v28 = vld [vmem:[#allocation7 + $0xa4] sm:$0xf] }
  0x31   : > { %v1494_v26 = vld [vmem:[#allocation7 + $0xac] sm:$0xf0]  ;;  %v1401_v27 = vor.u32 %v1530_v24, %v1400_v22  ;;  %v1258_v29 = vld [vmem:[#allocation7 + $0xb0] sm:$0xf0]  ;;  %v1524_v30 = vld [vmem:[#allocation7 + $0x1a4] sm:$0xf] }
  0x32   : > { %776 = vmatpush.bf16.msra.mxu0 %v1273_v18  ;;  %v1257_v31 = vor.u32 %v1494_v26, %v1256_v25  ;;  %v1386_v32 = vld [vmem:[#allocation7 + $0x1b0] sm:$0xf0]  ;;  %v1384_v33 = vld [vmem:[#allocation7 + $0x1a0] sm:$0xf]  ;;  %v1526_v34 = vld [vmem:[#allocation7 + $0x1ac] sm:$0xf0]  ;;  %v1261_v35 = vor.u32 %v1492_v28, %v1258_v29 }
  0x33   : > { %802 = vmatpush.bf16.msra.mxu2 %v1277_v19  ;;  %v1389_v36 = vor.u32 %v1524_v30, %v1386_v32  ;;  %v1240_v37 = vld [vmem:[#allocation7 + $0x80] sm:$0xf]  ;;  %v1490_v38 = vld [vmem:[#allocation7 + $0x8c] sm:$0xf0]  ;;  %v1488_v39 = vld [vmem:[#allocation7 + $0x84] sm:$0xf]  ;;  %v1385_v40 = vor.u32 %v1526_v34, %v1384_v33 }
  0x34   : > { %815 = vmatpush.bf16.msra.mxu3 %v1405_v23  ;;  %789 = vmatpush.bf16.msra.mxu1 %v1401_v27  ;;  %v1242_v41 = vld [vmem:[#allocation7 + $0x90] sm:$0xf0]  ;;  %v1520_v42 = vld [vmem:[#allocation7 + $0x184] sm:$0xf]  ;;  %v1368_v44 = vld [vmem:[#allocation7 + $0x180] sm:$0xf]  ;;  %v1241_v46 = vor.u32 %v1490_v38, %v1240_v37 }
  0x35   : > { %v1370_v43 = vld [vmem:[#allocation7 + $0x190] sm:$0xf0]  ;;  %v1522_v45 = vld [vmem:[#allocation7 + $0x18c] sm:$0xf0]  ;;  %v1245_v47 = vor.u32 %v1488_v39, %v1242_v41  ;;  %v1224_v49 = vld [vmem:[#allocation7 + $0x60] sm:$0xf] }
  0x36   : > { %777 = vmatpush.bf16.msra.mxu0 %v1257_v31  ;;  %v1373_v48 = vor.u32 %v1520_v42, %v1370_v43  ;;  %v1486_v50 = vld [vmem:[#allocation7 + $0x6c] sm:$0xf0]  ;;  %v1484_v51 = vld [vmem:[#allocation7 + $0x64] sm:$0xf]  ;;  %v1369_v52 = vor.u32 %v1522_v45, %v1368_v44  ;;  %v1226_v53 = vld [vmem:[#allocation7 + $0x70] sm:$0xf0] }
  0x37   : > { %803 = vmatpush.bf16.msra.mxu2 %v1261_v35  ;;  %v1516_v54 = vld [vmem:[#allocation7 + $0x164] sm:$0xf]  ;;  %v1354_v55 = vld [vmem:[#allocation7 + $0x170] sm:$0xf0]  ;;  %v1352_v56 = vld [vmem:[#allocation7 + $0x160] sm:$0xf]  ;;  %v1225_v58 = vor.u32 %v1486_v50, %v1224_v49  ;;  %v1229_v59 = vor.u32 %v1484_v51, %v1226_v53 }
  0x38   : > { %816 = vmatpush.bf16.msra.mxu3 %v1389_v36  ;;  %790 = vmatpush.bf16.msra.mxu1 %v1385_v40  ;;  %v1518_v57 = vld [vmem:[#allocation7 + $0x16c] sm:$0xf0]  ;;  %v1357_v60 = vor.u32 %v1516_v54, %v1354_v55  ;;  %v1208_v61 = vld [vmem:[#allocation7 + $0x40] sm:$0xf]  ;;  %v1480_v63 = vld [vmem:[#allocation7 + $0x44] sm:$0xf] }
  0x39   : > { %v1482_v62 = vld [vmem:[#allocation7 + $0x4c] sm:$0xf0]  ;;  %v1353_v0 = vor.u32 %v1518_v57, %v1352_v56  ;;  %v1210_v1 = vld [vmem:[#allocation7 + $0x50] sm:$0xf0]  ;;  %v1512_v2 = vld [vmem:[#allocation7 + $0x144] sm:$0xf] }
  0x3a   : > { %778 = vmatpush.bf16.msra.mxu0 %v1241_v46  ;;  %v1338_v3 = vld [vmem:[#allocation7 + $0x150] sm:$0xf0]  ;;  %v1336_v4 = vld [vmem:[#allocation7 + $0x140] sm:$0xf]  ;;  %v1514_v5 = vld [vmem:[#allocation7 + $0x14c] sm:$0xf0]  ;;  %v1209_v6 = vor.u32 %v1482_v62, %v1208_v61  ;;  %v1213_v8 = vor.u32 %v1480_v63, %v1210_v1 }
  0x3b   : > { %804 = vmatpush.bf16.msra.mxu2 %v1245_v47  ;;  %v1192_v7 = vld [vmem:[#allocation7 + $0x20] sm:$0xf]  ;;  %v1341_v9 = vor.u32 %v1512_v2, %v1338_v3  ;;  %v1478_v10 = vld [vmem:[#allocation7 + $0x2c] sm:$0xf0]  ;;  %v1476_v11 = vld [vmem:[#allocation7 + $0x24] sm:$0xf]  ;;  %v1337_v13 = vor.u32 %v1514_v5, %v1336_v4 }
  0x3c   : > { %817 = vmatpush.bf16.msra.mxu3 %v1373_v48  ;;  %791 = vmatpush.bf16.msra.mxu1 %v1369_v52  ;;  %v1194_v12 = vld [vmem:[#allocation7 + $0x30] sm:$0xf0]  ;;  %v1508_v14 = vld [vmem:[#allocation7 + $0x124] sm:$0xf]  ;;  %v1320_v16 = vld [vmem:[#allocation7 + $0x120] sm:$0xf]  ;;  %v1193_v20 = vor.u32 %v1478_v10, %v1192_v7 }
  0x3d   : > { %v1322_v15 = vld [vmem:[#allocation7 + $0x130] sm:$0xf0]  ;;  %v1510_v17 = vld [vmem:[#allocation7 + $0x12c] sm:$0xf0]  ;;  %v1176_v18 = vld [vmem:[#allocation7] sm:$0xf]  ;;  %v1197_v21 = vor.u32 %v1476_v11, %v1194_v12 }
  0x3e   : > { %779 = vmatpush.bf16.msra.mxu0 %v1225_v58  ;;  %v1474_v19 = vld [vmem:[#allocation7 + $0xc] sm:$0xf0]  ;;  %v1472_v22 = vld [vmem:[#allocation7 + $0x4] sm:$0xf]  ;;  %v1178_v23 = vld [vmem:[#allocation7 + $0x10] sm:$0xf0]  ;;  %v1325_v28 = vor.u32 %v1508_v14, %v1322_v15  ;;  %v1321_v33 = vor.u32 %v1510_v17, %v1320_v16 }
  0x3f   : > { %805 = vmatpush.bf16.msra.mxu2 %v1229_v59  ;;  %v1504_v24 = vld [vmem:[#allocation7 + $0x104] sm:$0xf]  ;;  %v1306_v25 = vld [vmem:[#allocation7 + $0x110] sm:$0xf0]  ;;  %v361_v26 = vld [vmem:[#allocation3] sm:$0x1]  ;;  %v1177_v41 = vor.u32 %v1474_v19, %v1176_v18  ;;  %v1181_v44 = vor.u32 %v1472_v22, %v1178_v23 }
  0x40   : > { %818 = vmatpush.bf16.msra.mxu3 %v1357_v60  ;;  %792 = vmatpush.bf16.msra.mxu1 %v1353_v0  ;;  %v363_v27 = vld [vmem:[%s351_s24] sm:$0x1]  ;;  %v1296_v29 = vld [vmem:[#allocation7 + $0xe8] sm:$0xf]  ;;  %v1503_v30 = vld [vmem:[#allocation7 + $0xf4] sm:$0xf0]  ;;  %v370_v32 = vpack.c.bf16 %v361_v26, %v361_v26  ;;  %v1309_v45 = vor.u32 %v1504_v24, %v1306_v25 }
  0x41   : > { %vm364_vm0 = vcmask 1040384   ;;  %vm365_vm1 = vsmask.f32 256  ;;  %v367_v31 = vld [vmem:[#allocation2] sm:$0x1]  ;;  %v1297_v48 = vor.u32 %v1503_v30, %v1296_v29  ;;  %p1465_p1 = scmp.ne.s32.totalorder %s1888_s0, 5 }
  0x42   : > { %780 = vmatpush.bf16.msra.mxu0 %v1209_v6  ;;  %v1501_v34 = vld [vmem:[#allocation7 + $0xec] sm:$0xf]  ;;  %vm366_vm2 = vmand %vm364_vm0, %vm365_vm1  ;;  %v371_v35 = vld [vmem:[#allocation2 + $0x1] sm:$0x1] }
  0x43   : > { %806 = vmatpush.bf16.msra.mxu2 %v1213_v8  ;;  %v1298_v36 = vld [vmem:[#allocation7 + $0xf8] sm:$0xf0]  ;;  %v1533_v37 = vld [vmem:[#allocation7 + $0x1ec] sm:$0xf]  ;;  %v368_v39 = vsel %vm366_vm2, %v363_v27, %v367_v31  ;;  %v372_v40 = vsel %vm366_vm2, %v370_v32, %v371_v35  ;;  %v1304_v42 = vld [vmem:[#allocation7 + $0x100] sm:$0xf] }
  0x44   : > { %819 = vmatpush.bf16.msra.mxu3 %v1341_v9  ;;  %793 = vmatpush.bf16.msra.mxu1 %v1337_v13  ;;  %v1426_v38 = vld [vmem:[#allocation7 + $0x1f8] sm:$0xf0]  ;;  %v1506_v43 = vld [vmem:[#allocation7 + $0x10c] sm:$0xf0]  ;;  %369 = vst [vmem:[#allocation2] sm:$0x1] %v368_v39  ;;  %v1301_v49 = vor.u32 %v1501_v34, %v1298_v36 }
  0x45   : > { %373 = vst [vmem:[#allocation2 + $0x1] sm:$0x1] %v372_v40  ;;  %v1424_v46 = vld [vmem:[#allocation7 + $0x1e8] sm:$0xf]  ;;  %v1535_v47 = vld [vmem:[#allocation7 + $0x1f4] sm:$0xf0]  ;;  %v1429_v51 = vor.u32 %v1533_v37, %v1426_v38  ;;  %v1305_v52 = vor.u32 %v1506_v43, %v1304_v42 }
  0x46   : > { %781 = vmatpush.bf16.msra.mxu0 %v1193_v20  ;;  %v1280_v50 = vld [vmem:[#allocation7 + $0xc8] sm:$0xf]  ;;  %v1499_v53 = vld [vmem:[#allocation7 + $0xd4] sm:$0xf0]  ;;  %v1497_v54 = vld [vmem:[#allocation7 + $0xcc] sm:$0xf]  ;;  %v1425_v56 = vor.u32 %v1535_v47, %v1424_v46 }
  0x47   : > { %807 = vmatpush.bf16.msra.mxu2 %v1197_v21  ;;  %v1282_v55 = vld [vmem:[#allocation7 + $0xd8] sm:$0xf0]  ;;  %v1529_v57 = vld [vmem:[#allocation7 + $0x1cc] sm:$0xf]  ;;  %v1408_v59 = vld [vmem:[#allocation7 + $0x1c8] sm:$0xf]  ;;  %v1281_v61 = vor.u32 %v1499_v53, %v1280_v50 }
  0x48   : > { %820 = vmatpush.bf16.msra.mxu3 %v1325_v28  ;;  %794 = vmatpush.bf16.msra.mxu1 %v1321_v33  ;;  %v1410_v58 = vld [vmem:[#allocation7 + $0x1d8] sm:$0xf0]  ;;  %v1531_v60 = vld [vmem:[#allocation7 + $0x1d4] sm:$0xf0]  ;;  %v1285_v62 = vor.u32 %v1497_v54, %v1282_v55  ;;  %v1264_v63 = vld [vmem:[#allocation7 + $0xa8] sm:$0xf] }
  0x49   : > { %v1413_v0 = vor.u32 %v1529_v57, %v1410_v58  ;;  %v1495_v1 = vld [vmem:[#allocation7 + $0xb4] sm:$0xf0]  ;;  %v1493_v2 = vld [vmem:[#allocation7 + $0xac] sm:$0xf]  ;;  %v1266_v3 = vld [vmem:[#allocation7 + $0xb8] sm:$0xf0]  ;;  %v1409_v5 = vor.u32 %v1531_v60, %v1408_v59 }
  0x4a   : > { %782 = vmatpush.bf16.msra.mxu0 %v1177_v41  ;;  %v1525_v6 = vld [vmem:[#allocation7 + $0x1ac] sm:$0xf]  ;;  %v1394_v7 = vld [vmem:[#allocation7 + $0x1b8] sm:$0xf0]  ;;  %v1392_v8 = vld [vmem:[#allocation7 + $0x1a8] sm:$0xf]  ;;  %v1265_v10 = vor.u32 %v1495_v1, %v1264_v63  ;;  %v1269_v11 = vor.u32 %v1493_v2, %v1266_v3 }
  0x4b   : > { %808 = vmatpush.bf16.msra.mxu2 %v1181_v44  ;;  %v1527_v9 = vld [vmem:[#allocation7 + $0x1b4] sm:$0xf0]  ;;  %v1397_v12 = vor.u32 %v1525_v6, %v1394_v7  ;;  %v1248_v13 = vld [vmem:[#allocation7 + $0x88] sm:$0xf]  ;;  %v1489_v16 = vld [vmem:[#allocation7 + $0x8c] sm:$0xf] }
  0x4c   : > { %821 = vmatpush.bf16.msra.mxu3 %v1309_v45  ;;  %795 = vmatpush.bf16.msra.mxu1 %v1305_v52  ;;  %v374_v4 = vld [vmem:[#allocation2] sm:$0x3]  ;;  %v1491_v14 = vld [vmem:[#allocation7 + $0x94] sm:$0xf0]  ;;  %v1393_v15 = vor.u32 %v1527_v9, %v1392_v8  ;;  %v1521_v18 = vld [vmem:[#allocation7 + $0x18c] sm:$0xf] }
  0x4d   : > { %441 = vst [vmem:[#allocation1] ss:$9 sm:$0xff] %v374_v4  ;;  %v1250_v17 = vld [vmem:[#allocation7 + $0x98] sm:$0xf0]  ;;  %v1376_v20 = vld [vmem:[#allocation7 + $0x188] sm:$0xf]  ;;  %v1249_v23 = vor.u32 %v1491_v14, %v1248_v13 }
  0x4e   : > { %827 = vmatpush.bf16.msrb.mxu0 %v1297_v48  ;;  %v1378_v19 = vld [vmem:[#allocation7 + $0x198] sm:$0xf0]  ;;  %v1523_v21 = vld [vmem:[#allocation7 + $0x194] sm:$0xf0]  ;;  %v1232_v22 = vld [vmem:[#allocation7 + $0x68] sm:$0xf]  ;;  %v1253_v24 = vor.u32 %v1489_v16, %v1250_v17 }
  0x4f   : > { %853 = vmatpush.bf16.msrb.mxu2 %v1301_v49  ;;  %v1487_v25 = vld [vmem:[#allocation7 + $0x74] sm:$0xf0]  ;;  %v1485_v26 = vld [vmem:[#allocation7 + $0x6c] sm:$0xf]  ;;  %v1234_v27 = vld [vmem:[#allocation7 + $0x78] sm:$0xf0]  ;;  %v1381_v30 = vor.u32 %v1521_v18, %v1378_v19  ;;  %v1377_v31 = vor.u32 %v1523_v21, %v1376_v20 }
  0x50   : > { %866 = vmatpush.bf16.msrb.mxu3 %v1429_v51  ;;  %840 = vmatpush.bf16.msrb.mxu1 %v1425_v56  ;;  %v1517_v32 = vld [vmem:[#allocation7 + $0x16c] sm:$0xf]  ;;  %v1362_v33 = vld [vmem:[#allocation7 + $0x178] sm:$0xf0]  ;;  %v1360_v34 = vld [vmem:[#allocation7 + $0x168] sm:$0xf]  ;;  %v1233_v36 = vor.u32 %v1487_v25, %v1232_v22  ;;  %v1237_v37 = vor.u32 %v1485_v26, %v1234_v27 }
  0x51   : > { %v1519_v35 = vld [vmem:[#allocation7 + $0x174] sm:$0xf0]  ;;  %v1216_v38 = vld [vmem:[#allocation7 + $0x48] sm:$0xf]  ;;  %v1365_v40 = vor.u32 %v1517_v32, %v1362_v33  ;;  %v1481_v42 = vld [vmem:[#allocation7 + $0x4c] sm:$0xf] }
  0x52   : > { %828 = vmatpush.bf16.msrb.mxu0 %v1281_v61  ;;  %v1483_v39 = vld [vmem:[#allocation7 + $0x54] sm:$0xf0]  ;;  %v1361_v41 = vor.u32 %v1519_v35, %v1360_v34  ;;  %v1218_v43 = vld [vmem:[#allocation7 + $0x58] sm:$0xf0]  ;;  %v1513_v44 = vld [vmem:[#allocation7 + $0x14c] sm:$0xf] }
  0x53   : > { %854 = vmatpush.bf16.msrb.mxu2 %v1285_v62  ;;  %v1346_v45 = vld [vmem:[#allocation7 + $0x158] sm:$0xf0]  ;;  %v1344_v46 = vld [vmem:[#allocation7 + $0x148] sm:$0xf]  ;;  %v1515_v47 = vld [vmem:[#allocation7 + $0x154] sm:$0xf0]  ;;  %v1217_v48 = vor.u32 %v1483_v39, %v1216_v38  ;;  %v1221_v49 = vor.u32 %v1481_v42, %v1218_v43 }
  0x54   : > { %867 = vmatpush.bf16.msrb.mxu3 %v1413_v0  ;;  %841 = vmatpush.bf16.msrb.mxu1 %v1409_v5  ;;  %v1954_v28 = vld [vmem:[#allocation1] sm:$0xff]  ;;  %v1956_v29 = vld [vmem:[#allocation1 + $0x9] sm:$0xff]  ;;  %v1200_v50 = vld [vmem:[#allocation7 + $0x28] sm:$0xf]  ;;  %v1349_v52 = vor.u32 %v1513_v44, %v1346_v45  ;;  %v1345_v53 = vor.u32 %v1515_v47, %v1344_v46 }
  0x55   : > { %809 = vmatmul.bf16.vlgmr.msra.gmra.mxu2 %v1954_v28  ;;  %822 = vmatmul.bf16.vlgmr.msra.gmra.mxu3 %v1956_v29  ;;  %v1479_v51 = vld [vmem:[#allocation7 + $0x34] sm:$0xf0]  ;;  %v1477_v54 = vld [vmem:[#allocation7 + $0x2c] sm:$0xf]  ;;  %v1202_v55 = vld [vmem:[#allocation7 + $0x38] sm:$0xf0] }
  0x56   : > { %829 = vmatpush.bf16.msrb.mxu0 %v1265_v10  ;;  %796 = vmatmul.bf16.vlgmr.msra.gmra.mxu1 %v1956_v29  ;;  %v1509_v56 = vld [vmem:[#allocation7 + $0x12c] sm:$0xf]  ;;  %v1330_v57 = vld [vmem:[#allocation7 + $0x138] sm:$0xf0]  ;;  %v1328_v58 = vld [vmem:[#allocation7 + $0x128] sm:$0xf]  ;;  %v1201_v60 = vor.u32 %v1479_v51, %v1200_v50  ;;  %v1205_v61 = vor.u32 %v1477_v54, %v1202_v55 }
  0x57   : > { %855 = vmatpush.bf16.msrb.mxu2 %v1269_v11  ;;  %783 = vmatmul.bf16.vlgmr.msra.gmra.mxu0 %v1954_v28  ;;  %v1511_v59 = vld [vmem:[#allocation7 + $0x134] sm:$0xf0]  ;;  %v1184_v62 = vld [vmem:[#allocation7 + $0x8] sm:$0xf]  ;;  %v1333_v0 = vor.u32 %v1509_v56, %v1330_v57  ;;  %v1473_v2 = vld [vmem:[#allocation7 + $0xc] sm:$0xf] }
  0x58   : > { %868 = vmatpush.bf16.msrb.mxu3 %v1397_v12  ;;  %842 = vmatpush.bf16.msrb.mxu1 %v1393_v15  ;;  %v1475_v63 = vld [vmem:[#allocation7 + $0x14] sm:$0xf0]  ;;  %v1329_v1 = vor.u32 %v1511_v59, %v1328_v58  ;;  %v1186_v3 = vld [vmem:[#allocation7 + $0x18] sm:$0xf0]  ;;  %v1505_v4 = vld [vmem:[#allocation7 + $0x10c] sm:$0xf] }
  0x59   : > { %v1314_v5 = vld [vmem:[#allocation7 + $0x118] sm:$0xf0]  ;;  %v1312_v6 = vld [vmem:[#allocation7 + $0x108] sm:$0xf]  ;;  %v1507_v7 = vld [vmem:[#allocation7 + $0x114] sm:$0xf0]  ;;  %v1185_v8 = vor.u32 %v1475_v63, %v1184_v62  ;;  %v1189_v9 = vor.u32 %v1473_v2, %v1186_v3 }
  0x5a   : > { %830 = vmatpush.bf16.msrb.mxu0 %v1249_v23  ;;  %v1317_v10 = vor.u32 %v1505_v4, %v1314_v5  ;;  %v1313_v11 = vor.u32 %v1507_v7, %v1312_v6  ;;  %v439_v12 = vld [vmem:[%s2063_s3] sm:$0xf]  ;;  %v1543_v23 = vld [vmem:[%s2064_s4 + $0x38] sm:$0xff]  ;;  %v1541_v33 = vld [vmem:[%s2064_s4 + $0x28] sm:$0xff] }
  0x5b   : > { %856 = vmatpush.bf16.msrb.mxu2 %v1253_v24  ;;  %v767_v13 = vperm.slane %v439_v12, 0  ;;  %v768_v17 = vperm.slane %v439_v12, 1  ;;  %v769_v34 = vperm.slane %v439_v12, 2  ;;  %v1539_v42 = vld [vmem:[%s2064_s4 + $0x18] sm:$0xff]  ;;  %v770_v45 = vperm.slane %v439_v12, 3  ;;  %v1538_v47 = vld [vmem:[%s2064_s4 + $0x10] sm:$0xff] }
  0x5c   : > { %869 = vmatpush.bf16.msrb.mxu3 %v1381_v30  ;;  %843 = vmatpush.bf16.msrb.mxu1 %v1377_v31  ;;  %v1537_v59 = vld [vmem:[%s2064_s4 + $0x8] sm:$0xff]  ;;  %v1536_v6 = vld [vmem:[%s2064_s4] sm:$0xff] }
  0x5d   : > { %v362_v12 = vld [vmem:[#allocation4] sm:$0x1] }
  0x5e   : > { %831 = vmatpush.bf16.msrb.mxu0 %v1233_v36  ;;  %v1540_v36 = vld [vmem:[%s2064_s4 + $0x20] sm:$0xff] }
  0x5f   : > { %857 = vmatpush.bf16.msrb.mxu2 %v1237_v37 }
  0x60   : > { %870 = vmatpush.bf16.msrb.mxu3 %v1365_v40  ;;  %844 = vmatpush.bf16.msrb.mxu1 %v1361_v41 }
  0x62   : > { %832 = vmatpush.bf16.msrb.mxu0 %v1217_v48 }
  0x63   : > { %858 = vmatpush.bf16.msrb.mxu2 %v1221_v49 }
  0x64   : > { %871 = vmatpush.bf16.msrb.mxu3 %v1349_v52  ;;  %845 = vmatpush.bf16.msrb.mxu1 %v1345_v53 }
  0x66   : > { %833 = vmatpush.bf16.msrb.mxu0 %v1201_v60 }
  0x67   : > { %859 = vmatpush.bf16.msrb.mxu2 %v1205_v61 }
  0x68   : > { %872 = vmatpush.bf16.msrb.mxu3 %v1333_v0  ;;  %846 = vmatpush.bf16.msrb.mxu1 %v1329_v1 }
  0x6a   : > { %834 = vmatpush.bf16.msrb.mxu0 %v1185_v8 }
  0x6b   : > { %860 = vmatpush.bf16.msrb.mxu2 %v1189_v9 }
  0x6c   : > { %873 = vmatpush.bf16.msrb.mxu3 %v1317_v10  ;;  %847 = vmatpush.bf16.msrb.mxu1 %v1313_v11 }
  0x6d   : > { %835 = vmatmul.bf16.vlgmr.msrb.gmra.mxu0 %v1954_v28 }
  0x6e   : > { %861 = vmatmul.bf16.vlgmr.msrb.gmra.mxu2 %v1954_v28  ;;  %1008 = vmatpush.bf16.msra.mxu0 %v1543_v23  ;;  %v1542_v28 = vld [vmem:[%s2064_s4 + $0x30] sm:$0xff] }
  0x6f   : > { %874 = vmatmul.bf16.vlgmr.msrb.gmra.mxu3 %v1956_v29  ;;  %848 = vmatmul.bf16.vlgmr.msrb.gmra.mxu1 %v1956_v29 }
  0x72   : > { %1009 = vmatpush.bf16.msra.mxu0 %v1542_v28 }
  0x76   : > { %1010 = vmatpush.bf16.msra.mxu0 %v1541_v33 }
  0x7a   : > { %1011 = vmatpush.bf16.msra.mxu0 %v1540_v36 }
  0x7e   : > { %1012 = vmatpush.bf16.msra.mxu0 %v1539_v42 }
  0x82   : > { %1013 = vmatpush.bf16.msra.mxu0 %v1538_v47 }
  0x86   : > { %1014 = vmatpush.bf16.msra.mxu0 %v1537_v59 }
  0x8a   : > { %1015 = vmatpush.bf16.msra.mxu0 %v1536_v6 }
  0xd3   : > { %v797_v15 = vpop.f32.mrf.mxu1 }
  0xd4   : > { %v784_v14 = vpop.f32.mrf.mxu0 }
  0xd5   : > { %v785_v16 = vadd.f32 %v784_v14, %v767_v13 }
  0xd7   : > { %v798_v18 = vadd.f32 %v797_v15, %v785_v16 }
  0xd8   : > { %v810_v19 = vpop.f32.mrf.mxu2  ;;  %v823_v20 = vpop.f32.mrf.mxu3 }
  0xd9   : > { %v1430_v21 = vmul.f32 -1.442695, %v798_v18  ;;  %v811_v22 = vadd.f32 %v810_v19, %v768_v17 }
  0xdb   : > { %1611 = vpow2.f32 %v1430_v21  ;;  %v824_v24 = vadd.f32 %v823_v20, %v811_v22  ;;  %v799_v26 = vpop.f32.mrf.mxu1 }
  0xdc   : > { %v786_v25 = vpop.f32.mrf.mxu0 }
  0xdd   : > { %v1431_v27 = vmul.f32 -1.442695, %v824_v24 }
  0xdf   : > { %1613 = vpow2.f32 %v1431_v27 }
  0xe0   : > { %v812_v30 = vpop.f32.mrf.mxu2  ;;  %v825_v31 = vpop.f32.mrf.mxu3 }
  0xe1   : > { %v1612_v29 = vpop.eup %1611 }
  0xe2   : > { %v882_v32 = vadd.f32 1.0, %v1612_v29 }
  0xe4   : > { %1615 = vrcp.f32 %v882_v32  ;;  %v892_v46 = vand.u32 2147483647, %v882_v32  ;;  %vm888_vm3 = vweird.f32 %v882_v32  ;;  %v894_v49 = vand.u32 2147483648, %v882_v32 }
  0xe5   : > { %v1614_v35 = vpop.eup %1613 }
  0xe6   : > { %v901_v37 = vadd.f32 1.0, %v1614_v35  ;;  %vm1991_vm6 = vcmp.eq.f32.partialorder %v892_v46, 8.507059e+37  ;;  %v895_v62 = vor.u32 1.1754944e-38, %v894_v49 }
  0xe8   : > { %1617 = vrcp.f32 %v901_v37  ;;  %v913_v60 = vand.u32 2147483648, %v901_v37  ;;  %vm907_vm7 = vweird.f32 %v901_v37  ;;  %v911_v2 = vand.u32 2147483647, %v901_v37 }
  0xea   : > { %v836_v38 = vpop.f32.mrf.mxu0  ;;  %v1616_v41 = vpop.eup %1615  ;;  %v914_v8 = vor.u32 1.1754944e-38, %v913_v60  ;;  %vm912_vm10 = vcmp.eq.f32.partialorder %v911_v2, 8.507059e+37 }
  0xeb   : > { %v837_v39 = vadd.f32 %v836_v38, %v769_v34  ;;  %v884_v43 = vmul.f32 %v1616_v41, %v882_v32  ;;  %vm889_vm4 = vweird.f32 %v1616_v41  ;;  %v959_v34 = vld [vmem:[%s2065_s5] sm:$0x1] }
  0xec   : > { %v849_v40 = vpop.f32.mrf.mxu1  ;;  %vm1987_vm5 = vmor %vm888_vm3, %vm889_vm4 }
  0xed   : > { %v850_v44 = vadd.f32 %v849_v40, %v837_v39  ;;  %v885_v48 = vsub.f32 1.0, %v884_v43 }
  0xee   : > { %v1618_v51 = vpop.eup %1617 }
  0xef   : > { %v886_v52 = vmul.f32 %v1616_v41, %v885_v48  ;;  %1619 = vtanh.f32 %v850_v44  ;;  %v903_v55 = vmul.f32 %v1618_v51, %v901_v37  ;;  %vm908_vm8 = vweird.f32 %v1618_v51 }
  0xf0   : > { %vm909_vm9 = vmor %vm907_vm7, %vm908_vm8 }
  0xf1   : > { %v862_v50 = vpop.f32.mrf.mxu2  ;;  %v887_v61 = vadd.f32 %v1616_v41, %v886_v52  ;;  %v904_v1 = vsub.f32 1.0, %v903_v55 }
  0xf2   : > { %v863_v53 = vadd.f32 %v862_v50, %v770_v45  ;;  %v875_v54 = vpop.f32.mrf.mxu3  ;;  %v838_v58 = vpop.f32.mrf.mxu0 }
  0xf3   : > { %v891_v3 = vsel %vm1987_vm5, %v1616_v41, %v887_v61  ;;  %v905_v5 = vmul.f32 %v1618_v51, %v904_v1 }
  0xf4   : > { %v876_v63 = vadd.f32 %v875_v54, %v863_v53  ;;  %v851_v0 = vpop.f32.mrf.mxu1  ;;  %v896_v9 = vsel %vm1991_vm6, %v895_v62, %v891_v3 }
  0xf5   : > { %v1620_v7 = vpop.eup %1619  ;;  %v906_v10 = vadd.f32 %v1618_v51, %v905_v5 }
  0xf6   : > { %v1432_v4 = vmul.f32 -1.442695, %v876_v63  ;;  %v938_v15 = vmul.f32 %v1620_v7, %v896_v9 }
  0xf7   : > { %v910_v14 = vsel %vm909_vm9, %v1618_v51, %v906_v10 }
  0xf8   : > { %1621 = vpow2.f32 %v1432_v4  ;;  %v915_v16 = vsel %vm912_vm10, %v914_v8, %v910_v14 }
  0xf9   : > { %v864_v11 = vpop.f32.mrf.mxu2  ;;  %v937_v17 = vmul.f32 %v915_v16, %v362_v12 }
  0xfa   : > { %v877_v13 = vpop.f32.mrf.mxu3 }
  0xfb   : > { %v939_v19 = vadd.f32 %v938_v15, %v937_v17 }
  0xfd   : > { %1036 = vst [vmem:[#allocation4] sm:$0x1] %v939_v19 }
  0xfe   : > { %v1622_v18 = vpop.eup %1621 }
  0xff   : > { %v921_v20 = vadd.f32 1.0, %v1622_v18 }
 0x101   : > { %1623 = vrcp.f32 %v921_v20  ;;  %v933_v24 = vand.u32 2147483648, %v921_v20  ;;  %v931_v26 = vand.u32 2147483647, %v921_v20  ;;  %vm927_vm12 = vweird.f32 %v921_v20 }
 0x102   : > { %1625 = vtanh.f32 %v939_v19 }
 0x103   : > { %v934_v28 = vor.u32 1.1754944e-38, %v933_v24  ;;  %vm932_vm14 = vcmp.eq.f32.partialorder %v931_v26, 8.507059e+37 }
 0x107   : > { %v1624_v21 = vpop.eup %1623 }
 0x108   : > { %v923_v22 = vmul.f32 %v1624_v21, %v921_v20  ;;  %vm928_vm11 = vweird.f32 %v1624_v21  ;;  %v1626_v30 = vpop.eup %1625 }
 0x109   : > { %vm929_vm13 = vmor %vm927_vm12, %vm928_vm11 }
 0x10a   : > { %v924_v23 = vsub.f32 1.0, %v923_v22 }
 0x10c   : > { %v925_v25 = vmul.f32 %v1624_v21, %v924_v23 }
 0x10e   : > { %v926_v27 = vadd.f32 %v1624_v21, %v925_v25 }
 0x110   : > { %v930_v29 = vsel %vm929_vm13, %v1624_v21, %v926_v27 }
 0x111   : > { %v935_v31 = vsel %vm932_vm14, %v934_v28, %v930_v29 }
 0x112   : > { %v941_v32 = vmul.f32 %v1626_v30, %v935_v31 }
 0x114   : > { %v942_v33 = vpack.c.bf16 %v941_v32, %v941_v32  ;;  %1035 = vst [vmem:[#allocation3] sm:$0x1] %v941_v32 }
 0x116   : > { %1016 = vmatmul.bf16.vlgmr.msra.gmra.mxu0 %v942_v33 }
 0x193   : > { %v1017_v35 = vpop.f32.mrf.mxu0 }
 0x194   : > { %v1018_v36 = vadd.f32 %v1017_v35, %v959_v34 }
 0x196   : > { %v1022_v37 = vsel %vm364_vm0, %v1018_v36, -inf }
 0x197   : > { %1023 = vmax.xlane.f32.xlu0 %v1022_v37 }
 0x19b   : > { %v1019_v38 = vpop.f32.mrf.mxu0 }
 0x20a   : > { %v1024_v39 = vpop.xlane.xlu0 %1023 }
 0x20b   : > { %v1025_v40 = vsub.f32 %v1018_v36, %v1024_v39 }
 0x20d   : > { %v1026_v41 = vmul.f32 1.442695, %v1025_v40 }
 0x20f   : > { %1627 = vpow2.f32 %v1026_v41 }
 0x215   : > { %v1628_v42 = vpop.eup %1627 }
 0x216   : > { %v1028_v43 = vsel %vm364_vm0, %v1628_v42, 0.0 }
 0x217   : > { %1029 = vadd.xlane.f32.xlu0 %v1028_v43 }
 0x28a   : > { %v1030_v44 = vpop.xlane.xlu0 %1029 }
 0x28b   : > { %1629 = vlog2.f32 %v1030_v44 }
 0x291   : > { %v1630_v45 = vpop.eup %1629 }
 0x292   : > { %v1032_v46 = vmul.f32 0.6931472, %v1630_v45  ;;  %1040 = sbr.rel (%p1465_p1) target bundleno = 665 (0x299), region = 60 }
 0x294   : > { %v1033_v47 = vsub.f32 %v1025_v40, %v1032_v46 }
 0x296   : > { %1034 = vst [vmem:[%s1938_s28] sm:$0x1] %v1033_v47 }
 0x297   : > { %1041 = vst [vmem:[#allocation11] sm:$0x1] %v941_v32 }
 0x298   : > { %1042 = vst [vmem:[#allocation13] sm:$0x1] %v939_v19 }
 0x299 PF: > { %s1068_s23 = sshll.u32 %s2069_s9, 4  ;;  %s1807_s24 = smov [#allocation11]   ;;  %s1069_s23 = int_to_ptr.hbm [resolvable:$true] %s1068_s23 }
 0x29a   : > { %s1066_s29 = sshll.u32 %s1807_s24, 4  ;;  %s1052_s12 = scalar_lea.hbm %s2068_s8, %s1888_s0  ;;  %s1067_s29 = int_to_ptr.vmem [resolvable:$true] %s1066_s29 }
 0x29b   : > { %1550 = dma.vmem_to_hbm [thread:$0]  (%p206_p2), %s1067_s29, 16, %s1069_s23, [#allocation12]  }
 0x29c   : > { %s1054_s13 = sshll.u32 %s1938_s28, 4  ;;  %s1056_s14 = sshll.u32 %s1052_s12, 4  ;;  %s1055_s13 = int_to_ptr.vmem [resolvable:$true] %s1054_s13  ;;  %s1057_s14 = int_to_ptr.hbm [resolvable:$true] %s1056_s14 }
 0x29d   : > { %s1044_s16 = scalar_lea.sflag [#allocation9], %s342_s15  ;;  %s1715_s21 = sshra.s32 %s1057_s14, 4  ;;  %s1716_s21 = int_to_ptr.hbm [resolvable:$true] %s1715_s21 }
 0x29e   : > { %s1717_s1 = scalar_lea.hbm %s1716_s21, 1  ;;  %s1721_s23 = scalar_lea.hbm %s2068_s8, 6 }
 0x29f   : > { %p1718_p3 = scmp.ne.s32.totalorder %s1716_s21, %s1717_s1  ;;  %p1722_p8 = scmp.lt.s32.totalorder %s1716_s21, %s2068_s8 }
 0x2a0   : > { %p1723_p9 = scmp.lt.s32.totalorder %s1721_s23, %s1717_s1 }
 0x2a1   : > { %p1719_p4 = pnand %p1718_p3, %p1907_p5 }
 0x2a2   : > { %p1724_p10 = por %p1723_p9, %p1722_p8 }
 0x2a3   : > { %p1720_p7 = pneg %p1719_p4 }
 0x2a5   : > { %p1725_p11 = pnand %p1724_p10, %p1720_p7 }
 0x2a7   : > { %1728 = shalt.err (!%p1725_p11)
}
 0x2a8   : > { %1548 = dma.vmem_to_hbm [thread:$0]  (%p1907_p5), %s1055_s13, 16, %s1057_s14, %s1044_s16  }
 0x2a9   : > { %s1808_s15 = smov [#allocation13]   ;;  %s1080_s2 = sshll.u32 %s2070_s10, 4  ;;  %s1081_s2 = int_to_ptr.hbm [resolvable:$true] %s1080_s2 }
 0x2aa   : > { %s1078_s28 = sshll.u32 %s1808_s15, 4  ;;  %s1079_s28 = int_to_ptr.vmem [resolvable:$true] %s1078_s28 }
 0x2ab   : > { %1552 = dma.vmem_to_hbm [thread:$0]  (%p206_p2), %s1079_s28, 16, %s1081_s2, [#allocation12]  }
 0x2ac   : > { %1780 = dma.done.wait (%p206_p2), [#allocation12], 32  }
 0x2ad   : > { %1782 = vsyncadd (%p206_p2), [#allocation12], 4294967264 }
 0x2ae PF: > { %p1572_p5 = scmp.ge.s32.totalorder %s1801_s20, 2  ;;  %s1102_s1 = sand.u32 1, %s1789_s17  }
 0x2af   : > { %s1103_s26 = scalar_lea.sflag [#allocation9], %s1102_s1 }
 0x2b0   : > { %p1563_p12 = pnand %p1572_p5, %p1911_p6 }
 0x2b2   : > { %p1564_p13 = pneg %p1563_p12 }
 0x2b4   : > { %1784 = dma.done.wait (%p1564_p13), %s1103_s26, 16  }
 0x2b5   : > { %1786 = vsyncadd (%p1564_p13), %s1103_s26, 4294967280  ;;  %p31_p0 = scmp.ge.s32.totalorder %s1892_s22, 8   ;;  %s2082_s17 = smov %s1793_s18 }
 0x2b6   : > { %s2083_s18 = smov %s1797_s19  ;;  %s2084_s19 = smov %s1903_s25 }
 0x2b7   : > { %s2085_s20 = smov %s1892_s22  ;;  %33 = sbr.rel (!%p31_p0) target bundleno = 12 (0xc), region = 112 }
 0x2bc   :  { %1108 = vsyncpa [#allocation8], 1 }
 0x2bd   :  { %1110 = vsyncpa [#allocation8 + $0x1], 1 }
 0x2be   :  { %1111 = vsyncpa [#allocation9], 1 }
 0x2bf   :  { %1113 = vsyncpa [#allocation9 + $0x1], 1 }
 0x2c0   :  { %1114 = vsyncpa [#allocation12], 1 }

</bundles_post_ra>
